<compile_context>
chip_gen: v6e
topology: v6e:2x2x1
jax: 0.10.0
libtpu: 0.0.40
codegen_flags: <defaults>
</compile_context>

<pallas_src>
import jax
import jax.numpy as jnp
from jax.experimental import pallas as pl
from jax.experimental.pallas import tpu as pltpu

_LANE = 128
_SUBLANE = 8


def _round_up(x, m):
    return ((x + m - 1) // m) * m


def _cdiv(a, b):
    return -(-a // b)


def _make_kernel(Tb, Hb, D, BN, C_pad):
    def kernel(a_ref, b_ref, wcat_ref, b1_ref, w1_ref, b2_ref, o_ref):
        # a_ref : (BN, Tb, C_pad)  xpad rows [t*Tb, (t+1)*Tb)          (main block)
        # b_ref : (BN, Hb, C_pad)  xpad rows [(t+1)*Tb, (t+1)*Tb + Hb) (halo)
        # wcat  : (3*C_pad, C_pad) fused dilated-conv taps [k=0; k=1; k=2]
        # b1,b2 : (1, C_pad) f32
        # w1    : (C_pad, C_pad)   1x1-conv weight (right-matmul layout)
        # o_ref : (BN, Tb, C_pad)
        in_dtype = a_ref.dtype

        # Sublane-aligned concat (Tb and Hb are multiples of 8) -> full window
        # covering all three taps of the Tb output rows.
        window = jnp.concatenate([a_ref[...], b_ref[...]], axis=1)  # (BN, Tb+Hb, C)

        xm = a_ref[...]                       # x[t - D]  (tap k=0)
        x0 = window[:, D:D + Tb, :]           # x[t]      (tap k=1) == residual
        xp = window[:, 2 * D:2 * D + Tb, :]   # x[t + D]  (tap k=2)

        # Fuse taps along lanes; flatten (batch, time) into the MXU M dim.
        x_cat = jnp.concatenate([xm, x0, xp], axis=-1).reshape(BN * Tb, 3 * C_pad)

        h = jnp.dot(x_cat, wcat_ref[...], preferred_element_type=jnp.float32)
        h = jnp.maximum(h + b1_ref[...], 0.0)          # bias + ReLU in f32
        h = h.astype(in_dtype)                         # bf16 models stay bf16 on MXU

        out = jnp.dot(h, w1_ref[...], preferred_element_type=jnp.float32)
        out = out + b2_ref[...]

        res = x0.reshape(BN * Tb, C_pad).astype(jnp.float32)
        o_ref[...] = (res + out).reshape(BN, Tb, C_pad).astype(o_ref.dtype)

    return kernel


def _pick_block_n(N, per_batch_bytes, avail_bytes, rows_per_batch, target_rows=1024):
    """Largest divisor of N that fits the VMEM budget; stop once the per-step
    matmul M dimension is big enough to amortise grid-step overhead."""
    best = 1
    for d in range(1, N + 1):
        if N % d:
            continue
        if d * per_batch_bytes > avail_bytes:
            break
        best = d
        if d * rows_per_batch >= target_rows:
            break
    return best


def dilated_residual_layer(x_nct, w_dil, b_dil, w_1x1, b_1x1, dilation, *,
                           vmem_budget_bytes=20 << 20, max_rows_per_step=2048):
    """x_nct: (N, C_in, T) -- PyTorch Conv1d layout.  Returns (N, C_out, T)."""
    N, C_in, T = x_nct.shape
    C_out, C_in_w, K = w_dil.shape
    assert C_in_w == C_in and K == 3
    assert C_in == C_out, "residual add requires in_channels == out_channels"
    D = int(dilation)
    assert D >= 1
    dtype = x_nct.dtype
    item = jnp.dtype(dtype).itemsize
    C_pad = _round_up(C_out, _LANE)

    # ---- tile-size selection ------------------------------------------------
    Hb = _round_up(2 * D, _SUBLANE)                       # halo rows (>= 2*D)
    weight_bytes = (2 * 4 * C_pad * C_pad) * item + 4 * C_pad * 4
    assert weight_bytes < vmem_budget_bytes, \
        "channel count too large for the fused-weight kernel"
    avail = vmem_budget_bytes - weight_bytes - 3 * Hb * C_pad * item
    per_row = C_pad * (9 * item + 12)            # pipeline buffers + temporaries
    rows_fit = max(Hb, avail // per_row)
    target = max(Hb, min(max_rows_per_step, rows_fit))

    nblocks = max(1, _cdiv(T, target))
    if nblocks == 1 and T >= 2 * Hb:
        nblocks = 2                    # >=2 time steps -> megacore + pipelining
    Tb = max(Hb, _round_up(_cdiv(T, nblocks), Hb))        # multiple of Hb (and 8)
    num_t = _cdiv(T, Tb)
    T_out = num_t * Tb
    L = (num_t + 1) * Tb               # padded time length of xpad (covers halos)

    per_batch = C_pad * ((3 * (Tb + Hb) + 6 * Tb) * item + 12 * Tb)
    block_n = _pick_block_n(N, per_batch, avail, Tb)
    grid_n = N // block_n
    tb_blocks = Tb // Hb                # exact: Tb is a multiple of Hb

    # ---- plain-JAX glue: layout + time/channel padding + weight fusion -------
    x_ntc = jnp.transpose(x_nct, (0, 2, 1))                                # (N, T, C)
    xpad = jnp.pad(x_ntc, ((0, 0), (D, L - T - D), (0, C_pad - C_in)))     # (N, L, C_pad)

    # PyTorch Conv1d weight (C_out, C_in, 3) -> per-tap (C_in, C_out), pad
    # channels to C_pad, fuse the 3 taps along the matmul K axis.
    w_taps = jnp.transpose(w_dil, (2, 1, 0))                               # (3, C_in, C_out)
    w_taps = jnp.pad(w_taps, ((0, 0), (0, C_pad - C_in), (0, C_pad - C_out)))
    w_cat = w_taps.reshape(3 * C_pad, C_pad).astype(dtype)                 # (3*C_pad, C_pad)
    b1 = jnp.pad(b_dil, (0, C_pad - C_out)).reshape(1, C_pad).astype(jnp.float32)
    w1 = jnp.pad(w_1x1[:, :, 0].T,
                 ((0, C_pad - C_out), (0, C_pad - C_out))).astype(dtype)   # (C_pad, C_pad)
    b2 = jnp.pad(b_1x1, (0, C_pad - C_out)).reshape(1, C_pad).astype(jnp.float32)

    kernel = _make_kernel(Tb, Hb, D, block_n, C_pad)

    cost = pl.CostEstimate(
        flops=2 * N * T_out * (3 * C_pad + C_pad) * C_pad,
        transcendentals=0,
        bytes_accessed=(N * (L + T_out) * C_pad + 4 * C_pad * C_pad) * item
                       + 2 * C_pad * 4,
    )

    out_pad = pl.pallas_call(
        kernel,
        out_shape=jax.ShapeDtypeStruct((N, T_out, C_pad), dtype),
        grid_spec=pltpu.PrefetchScalarGridSpec(
            num_scalar_prefetch=0,
            grid=(grid_n, num_t),
            in_specs=[
                # main time block
                pl.BlockSpec((block_n, Tb, C_pad), lambda n, t: (n, t, 0)),
                # halo: first Hb rows of the NEXT time block (same HBM array)
                pl.BlockSpec((block_n, Hb, C_pad),
                             lambda n, t: (n, (t + 1) * tb_blocks, 0)),
                pl.BlockSpec((3 * C_pad, C_pad), lambda n, t: (0, 0)),
                pl.BlockSpec((1, C_pad), lambda n, t: (0, 0)),
                pl.BlockSpec((C_pad, C_pad), lambda n, t: (0, 0)),
                pl.BlockSpec((1, C_pad), lambda n, t: (0, 0)),
            ],
            out_specs=pl.BlockSpec((block_n, Tb, C_pad), lambda n, t: (n, t, 0)),
        ),
        compiler_params=pltpu.CompilerParams(
            dimension_semantics=("parallel", "parallel"),
            vmem_limit_bytes=32 << 20),
        cost_estimate=cost,
    )(xpad, xpad, w_cat, b1, w1, b2)

    # Strip the time/channel padding and go back to (N, C_out, T).
    return jnp.transpose(out_pad[:, :T, :C_out], (0, 2, 1))


def _reference(x_nct, w_dil, b_dil, w_1x1, b_1x1, dilation):
    """Pure-JAX reference matching PyTorch Conv1d semantics."""
    dn = jax.lax.conv_dimension_numbers(x_nct.shape, w_dil.shape,
                                        ("NCH", "OIH", "NCH"))
    h = jax.lax.conv_general_dilated(
        x_nct, w_dil, window_strides=(1,),
        padding=[(dilation, dilation)], rhs_dilation=(dilation,),
        dimension_numbers=dn)
    h = h + b_dil[None, :, None]
    h = jnp.maximum(h, 0.0)
    o = jax.lax.conv_general_dilated(
        h, w_1x1, window_strides=(1,), padding=[(0, 0)],
        dimension_numbers=dn)
    o = o + b_1x1[None, :, None]
    return x_nct + o


if __name__ == "__main__":
    key = jax.random.PRNGKey(0)
    N, C, T, dilation = 4, 16, 24, 2

    k1, k2, k3, k4, k5 = jax.random.split(key, 5)
    x = jax.random.normal(k1, (N, C, T), dtype=jnp.float32)
    # Deterministic synthetic parameters (PyTorch Conv1d shapes).
    w_dil = jax.random.normal(k2, (C, C, 3), dtype=jnp.float32) * 0.1
    b_dil = jax.random.normal(k3, (C,), dtype=jnp.float32) * 0.1
    w_1x1 = jax.random.normal(k4, (C, C, 1), dtype=jnp.float32) * 0.1
    b_1x1 = jax.random.normal(k5, (C,), dtype=jnp.float32) * 0.1

    out = dilated_residual_layer(x, w_dil, b_dil, w_1x1, b_1x1, dilation)
    out = jax.block_until_ready(out)

    ref = _reference(x, w_dil, b_dil, w_1x1, b_1x1, dilation)
    assert out.shape == (N, C, T)
    assert jnp.allclose(out, ref, atol=1e-4, rtol=1e-4), \
        float(jnp.max(jnp.abs(out - ref)))

    print("KERNEL_OK")
</pallas_src>

<mosaic_0001>
module attributes {stable_mosaic.version = 11 : i64} {
  func.func @kernel(%arg0: i32, %arg1: i32, %arg2: memref<4x16x128xf32, #tpu.memory_space<vmem>>, %arg3: memref<4x8x128xf32, #tpu.memory_space<vmem>>, %arg4: memref<384x128xf32, #tpu.memory_space<vmem>>, %arg5: memref<1x128xf32, #tpu.memory_space<vmem>>, %arg6: memref<128x128xf32, #tpu.memory_space<vmem>>, %arg7: memref<1x128xf32, #tpu.memory_space<vmem>>, %arg8: memref<4x16x128xf32, #tpu.memory_space<vmem>>) attributes {dimension_semantics = [#tpu.dimension_semantics<parallel>, #tpu.dimension_semantics<parallel>], iteration_bounds = array<i64: 1, 2>, scalar_prefetch = 0 : i64, scratch_operands = 0 : i64, tpu.core_type = #tpu.core_type<tc>, window_params = [{transform_indices = @transform_0, window_bounds = array<i64: 4, 16, 128>}, {transform_indices = @transform_1, window_bounds = array<i64: 4, 8, 128>}, {pipeline_mode = #tpu.pipeline_mode<synchronous>, transform_indices = @transform_2, window_bounds = array<i64: 384, 128>}, {pipeline_mode = #tpu.pipeline_mode<synchronous>, transform_indices = @transform_3, window_bounds = array<i64: 1, 128>}, {pipeline_mode = #tpu.pipeline_mode<synchronous>, transform_indices = @transform_4, window_bounds = array<i64: 128, 128>}, {pipeline_mode = #tpu.pipeline_mode<synchronous>, transform_indices = @transform_5, window_bounds = array<i64: 1, 128>}, {transform_indices = @transform_6, window_bounds = array<i64: 4, 16, 128>}]} {
    %c0 = arith.constant 0 : index
    %c0_0 = arith.constant 0 : index
    %c0_1 = arith.constant 0 : index
    %0 = vector.load %arg2[%c0, %c0_0, %c0_1] : memref<4x16x128xf32, #tpu.memory_space<vmem>>, vector<4x16x128xf32>
    %c0_2 = arith.constant 0 : index
    %c0_3 = arith.constant 0 : index
    %c0_4 = arith.constant 0 : index
    %1 = vector.load %arg3[%c0_2, %c0_3, %c0_4] : memref<4x8x128xf32, #tpu.memory_space<vmem>>, vector<4x8x128xf32>
    %2 = tpu.concatenate %0, %1 in 1 : vector<4x16x128xf32>, vector<4x8x128xf32> -> vector<4x24x128xf32>
    %c0_5 = arith.constant 0 : index
    %c0_6 = arith.constant 0 : index
    %c0_7 = arith.constant 0 : index
    %3 = vector.load %arg2[%c0_5, %c0_6, %c0_7] : memref<4x16x128xf32, #tpu.memory_space<vmem>>, vector<4x16x128xf32>
    %4 = vector.extract_strided_slice %2 {offsets = [0, 2, 0], sizes = [4, 16, 128], strides = [1, 1, 1]} : vector<4x24x128xf32> to vector<4x16x128xf32>
    %5 = vector.extract_strided_slice %2 {offsets = [0, 4, 0], sizes = [4, 16, 128], strides = [1, 1, 1]} : vector<4x24x128xf32> to vector<4x16x128xf32>
    %6 = tpu.concatenate %3, %4, %5 in 2 : vector<4x16x128xf32>, vector<4x16x128xf32>, vector<4x16x128xf32> -> vector<4x16x384xf32>
    %7 = vector.shape_cast %6 : vector<4x16x384xf32> to vector<64x384xf32>
    %c0_8 = arith.constant 0 : index
    %c0_9 = arith.constant 0 : index
    %8 = vector.load %arg4[%c0_8, %c0_9] : memref<384x128xf32, #tpu.memory_space<vmem>>, vector<384x128xf32>
    %cst = arith.constant dense<0.000000e+00> : vector<64x128xf32>
    %9 = tpu.matmul %7, %8, %cst {dimension_numbers = #tpu.dot_dimension_numbers<[1], [0], [0], [1], [0, 0, 1, 1], [], []>} : vector<64x384xf32>, vector<384x128xf32>, vector<64x128xf32> -> vector<64x128xf32>
    %c0_10 = arith.constant 0 : index
    %c0_11 = arith.constant 0 : index
    %10 = vector.load %arg5[%c0_10, %c0_11] : memref<1x128xf32, #tpu.memory_space<vmem>>, vector<1x128xf32>
    %11 = vector.broadcast %10 : vector<1x128xf32> to vector<64x128xf32>
    %12 = arith.addf %9, %11 : vector<64x128xf32>
    %cst_12 = arith.constant 0.000000e+00 : f32
    %13 = vector.broadcast %cst_12 : f32 to vector<64x128xf32>
    %14 = arith.maximumf %12, %13 : vector<64x128xf32>
    %c0_13 = arith.constant 0 : index
    %c0_14 = arith.constant 0 : index
    %15 = vector.load %arg6[%c0_13, %c0_14] : memref<128x128xf32, #tpu.memory_space<vmem>>, vector<128x128xf32>
    %cst_15 = arith.constant dense<0.000000e+00> : vector<64x128xf32>
    %16 = tpu.matmul %14, %15, %cst_15 {dimension_numbers = #tpu.dot_dimension_numbers<[1], [0], [0], [1], [0, 0, 1, 1], [], []>} : vector<64x128xf32>, vector<128x128xf32>, vector<64x128xf32> -> vector<64x128xf32>
    %c0_16 = arith.constant 0 : index
    %c0_17 = arith.constant 0 : index
    %17 = vector.load %arg7[%c0_16, %c0_17] : memref<1x128xf32, #tpu.memory_space<vmem>>, vector<1x128xf32>
    %18 = vector.broadcast %17 : vector<1x128xf32> to vector<64x128xf32>
    %19 = arith.addf %16, %18 : vector<64x128xf32>
    %20 = vector.shape_cast %4 : vector<4x16x128xf32> to vector<64x128xf32>
    %21 = arith.addf %20, %19 : vector<64x128xf32>
    %22 = vector.shape_cast %21 : vector<64x128xf32> to vector<4x16x128xf32>
    %c0_18 = arith.constant 0 : index
    %c0_19 = arith.constant 0 : index
    %c0_20 = arith.constant 0 : index
    %23 = vector.load %arg8[%c0_18, %c0_19, %c0_20] : memref<4x16x128xf32, #tpu.memory_space<vmem>>, vector<4x16x128xf32>
    tpu.vector_store %arg8[%c0_18, %c0_19, %c0_20], %22 {strides = array<i32>} : memref<4x16x128xf32, #tpu.memory_space<vmem>>, vector<4x16x128xf32>,
    return
  }
  func.func @transform_0(%arg0: i32, %arg1: i32) -> (i32, i32, i32) {
    %c0_i32 = arith.constant 0 : i32
    %c0_i32_0 = arith.constant 0 : i32
    return %arg0, %arg1, %c0_i32 : i32, i32, i32
  }
  func.func @transform_1(%arg0: i32, %arg1: i32) -> (i32, i32, i32) {
    %c1_i32 = arith.constant 1 : i32
    %0 = arith.addi %arg1, %c1_i32 : i32
    %c2_i32 = arith.constant 2 : i32
    %1 = arith.muli %0, %c2_i32 : i32
    %c0_i32 = arith.constant 0 : i32
    %c0_i32_0 = arith.constant 0 : i32
    return %arg0, %1, %c0_i32 : i32, i32, i32
  }
  func.func @transform_2(%arg0: i32, %arg1: i32) -> (i32, i32) {
    %c0_i32 = arith.constant 0 : i32
    %c0_i32_0 = arith.constant 0 : i32
    %c0_i32_1 = arith.constant 0 : i32
    return %c0_i32, %c0_i32_0 : i32, i32
  }
  func.func @transform_3(%arg0: i32, %arg1: i32) -> (i32, i32) {
    %c0_i32 = arith.constant 0 : i32
    %c0_i32_0 = arith.constant 0 : i32
    %c0_i32_1 = arith.constant 0 : i32
    return %c0_i32, %c0_i32_0 : i32, i32
  }
  func.func @transform_4(%arg0: i32, %arg1: i32) -> (i32, i32) {
    %c0_i32 = arith.constant 0 : i32
    %c0_i32_0 = arith.constant 0 : i32
    %c0_i32_1 = arith.constant 0 : i32
    return %c0_i32, %c0_i32_0 : i32, i32
  }
  func.func @transform_5(%arg0: i32, %arg1: i32) -> (i32, i32) {
    %c0_i32 = arith.constant 0 : i32
    %c0_i32_0 = arith.constant 0 : i32
    %c0_i32_1 = arith.constant 0 : i32
    return %c0_i32, %c0_i32_0 : i32, i32
  }
  func.func @transform_6(%arg0: i32, %arg1: i32) -> (i32, i32, i32) {
    %c0_i32 = arith.constant 0 : i32
    %c0_i32_0 = arith.constant 0 : i32
    return %arg0, %arg1, %c0_i32 : i32, i32, i32
  }
}

</mosaic_0001>

<bundles_post_ra>
// kernel: tpu_custom_call.1
= control target key start
LH: loop header
LB: loop body
LE: loop exit
PB: predicated region body
PF: predicated region fallthrough
CT: control target
= control target key end

     0   :  { %s2074_s0 = inlined_call_operand.hbm [shape: f32[4,48,128], index: 0, kind: input, shape index: {}]   ;;  %s2075_s1 = inlined_call_operand.hbm [shape: f32[4,48,128], index: 1, kind: input, shape index: {}]   ;;  %s2076_s2 = inlined_call_operand.hbm [shape: f32[384,128], index: 2, kind: input, shape index: {}]   ;;  %s2077_s3 = inlined_call_operand.vmem [shape: f32[1,128], index: 3, kind: input, shape index: {}]   ;;  %s2078_s4 = inlined_call_operand.hbm [shape: f32[128,128], index: 4, kind: input, shape index: {}]   ;;  %s2079_s5 = inlined_call_operand.vmem [shape: f32[1,128], index: 5, kind: input, shape index: {}]   ;;  %s2080_s6 = inlined_call_operand.hbm [shape: f32[4,32,128], index: 6, kind: output, shape index: {}]  }
   0x1   :  { %2094 = sst [smem:[#allocation30_spill]] %s2074_s0 }
   0x2   :  { %2095 = sst [smem:[#allocation31_spill]] %s2076_s2 }
   0x3   :  { %2096 = sst [smem:[#allocation32_spill]] %s2078_s4 }
   0x4   :  { %2097 = sst [smem:[#allocation33_spill]] %s2080_s6 }
   0x5   :  { %11 = vsyncpa [#allocation3], 0 }
   0x6   :  { %13 = vsyncpa [#allocation3 + $0x1], 0 }
   0x7   :  { %14 = vsyncpa [#allocation6], 0 }
   0x8   :  { %16 = vsyncpa [#allocation6 + $0x1], 0 }
   0x9   :  { %17 = vsyncpa [#allocation9], 0 }
   0xa   :  { %18 = vsyncpa [#allocation4], 0 }
   0xb   :  { %20 = vsyncpa [#allocation4 + $0x1], 0  ;;  %s1694_s21 = smov 0   ;;  %s1696_s22 = smov 0  }
   0xc   :  { %s1698_s23 = smov 0   ;;  %s1700_s24 = smov 0  }
   0xd   :  { %s1702_s25 = smov 0   ;;  %s1704_s26 = smov 0  }
   0xe   :  { %s1706_s27 = smov 0   ;;  %s1708_s28 = smov 0  }
   0xf   :  { %s1710_s29 = smov 0  }
  0x10 LB: > { %2098 = sst [smem:[#allocation21_spill]] %s1616_s24  ;;  %s1740_s30 = sadd.s32 4294967295, %s1636_s29   ;;  %s1636_s29 = sphi %s1710_s29, %s26_s29   ;;  %s1632_s28 = sphi %s1708_s28, %s2137_s28   ;;  %s1628_s27 = sphi %s1706_s27, %s2136_s27   ;;  %s1624_s26 = sphi %s1704_s26, %s2135_s26   ;;  %s1620_s25 = sphi %s1702_s25, %s2142_s25   ;;  %s1616_s24 = sphi %s1700_s24, %s2141_s24   ;;  %s1612_s23 = sphi %s1698_s23, %s2140_s23   ;;  %s1608_s22 = sphi %s1696_s22, %s2139_s22   ;;  %s1604_s21 = sphi %s1694_s21, %s2138_s21  }
  0x11   : > { %2099 = sst [smem:[#allocation22_spill]] %s1624_s26  ;;  %s1073_s7 = sadd.s32 4294967294, %s1636_s29  }
  0x12   : > { %2100 = sst [smem:[#allocation23_spill]] %s1628_s27  ;;  %s35_s8 = sadd.s32 1, %s1632_s28 }
  0x13   : > { %2101 = sst [smem:[#allocation24_spill]] %s1632_s28  ;;  %s47_s9 = sadd.s32 1, %s1624_s26 }
  0x14   : > { %p36_p0 = scmp.ge.s32.totalorder %s35_s8, 2  ;;  %p54_p1 = scmp.ne.s32.totalorder %s1624_s26, %s1620_s25 }
  0x15   : > { %p55_p2 = scmp.eq.s32.totalorder %s1636_s29, 0  ;;  %p2081_p3 = scmp.ne.s32.totalorder %s1620_s25, %s1616_s24 }
  0x16   : > { %s2144_s8 = smov (%p36_p0, %s35_s8), 0  ;;  %p2086_p5 = scmp.eq.s32.totalorder %s1740_s30, 0 }
  0x17   : > { %2102 = sst [smem:[#allocation25_spill]] %s2144_s8  ;;  %p1757_p4 = por %p55_p2, %p54_p1 }
  0x18   : > { %s43_s11 = ssub.s32 %s1632_s28, %s2144_s8  ;;  %s1101_s12 = sshll.u32 %s1632_s28, 1 }
  0x19   : > { %p45_p6 = scmp.eq.s32.totalorder %s43_s11, 0  ;;  %p1770_p7 = por %p2086_p5, %p2081_p3 }
  0x1a   : > { %s1102_s14 = sadd.s32 2, %s1101_s12  ;;  %s1103_s15 = sshll.u32 %s2144_s8, 1 }
  0x1b   : > { %s2104_s13 = scalar_select %p1770_p7, 1, 0 }
  0x1c   : > { %s1776_s16 = scalar_select %p45_p6, %s1624_s26, %s47_s9  }
  0x1d   : > { %s1104_s17 = sadd.s32 2, %s1103_s15  ;;  %s79_s18 = sadd.s32 1, %s1612_s23 }
  0x1e   : > { %2105 = sst [smem:[#allocation26_spill]] %s1776_s16  ;;  %s75_s19 = ssub.s32 %s1102_s14, %s1104_s17 }
  0x1f   : > { %p86_p8 = scmp.ne.s32.totalorder %s1612_s23, %s1608_s22  ;;  %p77_p9 = scmp.eq.s32.totalorder %s75_s19, 0 }
  0x20   : > { %p92_p10 = scmp.ne.s32.totalorder %s1608_s22, %s1604_s21  ;;  %p202_p12 = scmp.eq.s32.totalorder %s1740_s30, 1 }
  0x21   : > { %p1785_p11 = por %p86_p8, %p55_p2  ;;  %p208_p6 = scmp.eq.s32.totalorder %s1073_s7, 1 }
  0x22   : > { %s1791_s11 = scalar_select %p77_p9, %s1612_s23, %s79_s18  }
  0x23   : > { %p1795_p13 = por %p92_p10, %p2086_p5  ;;  %p1802_p0 = por %p202_p12, %p54_p1 }
  0x24   : > { %2107 = sst [smem:[#allocation27_spill]] %s1791_s11  ;;  %p1076_p3 = scmp.ge.s32.totalorder %s1636_s29, 1 }
  0x25   : > { %s2108_s12 = scalar_select %p1795_p13, 1, 0 }
  0x26   : > { %s2109_s9 = scalar_select %p1802_p0, 1, 0 }
  0x27   : > { %p215_p7 = scmp.lt.s32.totalorder %s1636_s29, 3  ;;  %p2111_p2 = scmp.ne.s32.totalorder %s1620_s25, %s1616_s24 }
  0x28   : > { %2110 = sst [smem:[#allocation28_spill]] %s2109_s9  ;;  %s1638_s15 = smov [#allocation7]  }
  0x29   : > { %p1811_p8 = por %p208_p6, %p2111_p2  ;;  %p1815_p9 = pnand %p1076_p3, %p215_p7 }
  0x2a   : > { %s227_s17 = sshll.u32 %s1638_s15, 4  ;;  %s1639_s18 = smov [#allocation8]   ;;  %s228_s17 = int_to_ptr.vmem [resolvable:$true] %s227_s17 }
  0x2b   : > { %s2112_s21 = scalar_select %p1811_p8, 1, 0 }
  0x2c   : > { %s2114_s14 = scalar_select %p1815_p9, 1, 0 }
  0x2d   : > { %2113 = sst [smem:[#allocation29_spill]] %s2112_s21  ;;  %p1359_p1 = pneg %p1815_p9 }
  0x2e   : > { %s243_s19 = sshll.u32 %s1639_s18, 4  ;;  %s1478_s8 = scalar_lea.vmem %s228_s17, 6144  ;;  %s244_s19 = int_to_ptr.vmem [resolvable:$true] %s243_s19 }
  0x2f   : > { %p1823_p10 = pnand %p1359_p1, %p2086_p5  ;;  %p1479_p7 = scmp.ne.s32.totalorder %s228_s17, %s1478_s8 }
  0x30   : > { %p1486_p2 = scmp.lt.s32.totalorder %s228_s17, %s228_s17  ;;  %p1487_p8 = scmp.lt.s32.totalorder %s1478_s8, %s1478_s8 }
  0x31   : > { %p1469_p3 = pneg %p1823_p10 }
  0x32   : > { %p1488_p0 = por %p1487_p8, %p1486_p2 }
  0x33   : > { %p1481_p12 = pnand %p1479_p7, %p1469_p3 }
  0x35   : > { %p1482_p6 = pneg %p1481_p12 }
  0x37   : > { %p1489_p1 = pnand %p1488_p0, %p1482_p6 }
  0x39   : > { %1492 = shalt.err (!%p1489_p1)
}
  0x3a   : > { %s1640_s15 = smov 128   ;;  %s1641_s16 = smov 8  }
  0x3b   : > { %s2116_s2 = sld [smem:[#allocation31_spill]]  ;;  %s1504_s21 = scalar_lea.vmem %s244_s19, 2048 }
  0x3c   : > { %p1505_p5 = scmp.ne.s32.totalorder %s244_s19, %s1504_s21  ;;  %p1512_p13 = scmp.lt.s32.totalorder %s244_s19, %s244_s19 }
  0x3d   : > { %p1513_p9 = scmp.lt.s32.totalorder %s1504_s21, %s1504_s21 }
  0x3e   : > { %p1507_p7 = pnand %p1505_p5, %p1469_p3 }
  0x3f   : > { %p1514_p8 = por %p1513_p9, %p1512_p13 }
  0x40   : > { %p1508_p12 = pneg %p1507_p7 }
  0x41   : > { %1362 = dma.hbm_to_vmem [thread:$0]  (!%p1823_p10), %s2116_s2, 6144, %s228_s17, [#allocation6], %s1640_s15, %s1640_s15, %s1641_s16  }
  0x42   : > { %p1515_p0 = pnand %p1514_p8, %p1508_p12 }
  0x44   : > { %1518 = shalt.err (!%p1515_p0)
}
  0x45   : > { %s2117_s4 = sld [smem:[#allocation32_spill]]  ;;  %p1079_p6 = scmp.ge.s32.totalorder %s1636_s29, 2 }
  0x47   : > { %256 = sbr.rel (%p1079_p6) target bundleno = 107 (0x6b), region = 32 }
  0x4b   : > { %1365 = dma.hbm_to_vmem [thread:$0]  (!%p1823_p10), %s2117_s4, 2048, %s244_s19, [#allocation9], %s1640_s15, %s1640_s15, %s1641_s16  }
  0x4c   : > { %s260_s11 = sand.u32 1, %s1624_s26   ;;  %s1105_s21 = sshll.u32 %s1632_s28, 8 }
  0x4d   : > { %s1080_s17 = sshll.u32 %s260_s11, 6  ;;  %s2118_s0 = sld [smem:[#allocation30_spill]] }
  0x4e   : > { %s1336_s16 = scalar_select %p1757_p4, [#allocation0], [#allocation15] }
  0x4f   : > { %s264_s19 = scalar_lea.vmem [#allocation2], %s1080_s17  ;;  %s1642_s2 = smov 768  }
  0x50   : > { %s286_s15 = sshll.u32 %s264_s19, 4  ;;  %s278_s8 = sld [smem:[%s1336_s16]]   ;;  %s287_s15 = int_to_ptr.vmem [resolvable:$true] %s286_s15 }
  0x51   : > { %1337 = sst [smem:[#allocation12]] (%p1757_p4), %s1642_s2  ;;  %s1643_s4 = smov 256  }
  0x52   : > { %1338 = sst [smem:[#allocation12 + $0x1]] (%p1757_p4), %s1643_s4  ;;  %s1644_s28 = smov 2  }
  0x53   : > { %s273_s24 = scalar_lea.hbm %s2118_s0, %s1105_s21  ;;  %1339 = sst [smem:[#allocation12 + $0x2]] (%p1757_p4), %s1644_s28 }
  0x54   : > { %s1645_s26 = smov 128   ;;  %s1646_s17 = smov 8  }
  0x55   : > { %1340 = sst [smem:[#allocation12 + $0x3]] (%p1757_p4), %s1645_s26  ;;  %s261_s16 = scalar_lea.sflag [#allocation3], %s260_s11 }
  0x56   : > { %1341 = sst [smem:[#allocation12 + $0x4]] (%p1757_p4), %s1645_s26  ;;  %s1083_s7 = sshll.u32 %s278_s8, 26 }
  0x57   : > { %1342 = sst [smem:[#allocation12 + $0x5]] (%p1757_p4), %s1646_s17  ;;  %s1084_s18 = sadd.s32 134217728, %s1083_s7 }
  0x58   : > { %s1647_s19 = smov 131072   ;;  %s309_s2 = sand.u32 1, %s1636_s29  }
  0x59   : > { %1343 = dma.general (%p1757_p4), %s273_s24, 1024, %s287_s15, %s261_s16, %s1647_s19, [#allocation12], %s1084_s18, 0  }
  0x5a   : > { %s311_s4 = sand.u32 1, %s1612_s23   ;;  %s985_s9 = scalar_lea.hbm %s2075_s1, %s1105_s21 }
  0x5b   : > { %s1085_s28 = sshll.u32 %s311_s4, 5  ;;  %s986_s26 = scalar_lea.hbm %s985_s9, 256 }
  0x5c   : > { %s313_s8 = scalar_lea.vmem [#allocation5], %s1085_s28  ;;  %s310_s17 = scalar_lea.sflag [#allocation6], %s309_s2 }
  0x5d   : > { %s324_s27 = sshll.u32 %s313_s8, 4  ;;  %s1648_s10 = smov [#allocation5]   ;;  %s325_s27 = int_to_ptr.vmem [resolvable:$true] %s324_s27 }
  0x5e   : > { %s1531_s7 = scalar_lea.vmem %s325_s27, 512  ;;  %s1535_s11 = sshll.u32 %s1648_s10, 4  ;;  %s1536_s11 = int_to_ptr.vmem [resolvable:$false] %s1535_s11 }
  0x5f   : > { %p1532_p5 = scmp.ne.s32.totalorder %s325_s27, %s1531_s7  ;;  %s1537_s24 = scalar_lea.vmem %s1536_s11, 1024 }
  0x60   : > { %p1538_p9 = scmp.lt.s32.totalorder %s325_s27, %s1536_s11  ;;  %p1539_p10 = scmp.lt.s32.totalorder %s1537_s24, %s1531_s7 }
  0x61   : > { %p1533_p13 = pnand %p1532_p5, %p1785_p11 }
  0x62   : > { %p1540_p3 = por %p1539_p10, %p1538_p9 }
  0x63   : > { %p1534_p4 = pneg %p1533_p13 }
  0x65   : > { %p1541_p2 = pnand %p1540_p3, %p1534_p4 }
  0x67   : > { %1544 = shalt.err (!%p1541_p2)
}
  0x68   : > { %s1649_s0 = smov 768   ;;  %s1650_s6 = smov 128  }
  0x69   : > { %s1651_s9 = smov 8  }
  0x6a   : > { %1344 = dma.hbm_to_vmem [thread:$0]  (%p1785_p11), %s986_s26, 512, %s325_s27, %s310_s17, %s1649_s0, %s1650_s6, %s1651_s9  }
  0x6b PF: > { %p2119_p1 = scmp.ne.s32.totalorder %s2114_s14, 0 }
  0x6c   : > { %s1881_s21 = sand.u32 (!%p2119_p1), 1, %s1620_s25   ;;  %p2120_p7 = scmp.ne.s32.totalorder (!%p2119_p1), %s2104_s13, 0 }
  0x6d   : > { %336 = sbr.rel (%p2119_p1) target bundleno = 608 (0x260), region = 44  ;;  %s1089_s15 = sshll.u32 (!%p2119_p1), %s1881_s21, 6 }
  0x6e   : > { %s339_s18 = scalar_lea.sflag (!%p2119_p1), [#allocation3], %s1881_s21  ;;  %s1887_s16 = scalar_lea.vmem (!%p2119_p1), [#allocation2], %s1089_s15 }
  0x72   : > { %1583 = dma.done.wait (%p2120_p7), %s339_s18, 1024  }
  0x73   : > { %1585 = vsyncadd (%p2120_p7), %s339_s18, 4294966272  ;;  %s347_s27 = sand.u32 1, %s1740_s30   ;;  %s349_s20 = sand.u32 1, %s1608_s22  }
  0x74   : > { %s1090_s14 = sshll.u32 %s349_s20, 5  ;;  %s348_s19 = scalar_lea.sflag [#allocation6], %s347_s27 }
  0x75   : > { %s1895_s2 = scalar_lea.vmem [#allocation5], %s1090_s14  ;;  %p2121_p11 = scmp.ne.s32.totalorder %s2108_s12, 0 }
  0x77   : > { %1587 = dma.done.wait (%p2121_p11), %s348_s19, 512  }
  0x78   : > { %1589 = vsyncadd (%p2121_p11), %s348_s19, 4294966784  ;;  %p2122_p12 = scmp.eq.s32.totalorder %s1740_s30, 0 }
  0x7a   : > { %1591 = dma.done.wait (%p2122_p12), [#allocation6], 6144   ;;  %p2123_p8 = pmov %p2122_p12 }
  0x7c   : > { %1593 = vsyncadd (%p2123_p8), [#allocation6], 4294961152  ;;  %p2124_p0 = pmov %p2123_p8 }
  0x7e   : > { %1595 = dma.done.wait (%p2124_p0), [#allocation9], 2048   ;;  %p2125_p5 = pmov %p2124_p0 }
  0x7f   : > { %v513_v0 = vld [vmem:[#allocation7 + $0xf8] sm:$0xff]  ;;  %v512_v2 = vld [vmem:[#allocation7 + $0xf0] sm:$0xff]  ;;  %v511_v5 = vld [vmem:[#allocation7 + $0xe8] sm:$0xff]  ;;  %vm424_vm0 = vcmask 1045504   ;;  %vm453_vm1 = vcmask 1043456   ;;  %s2005_s28 = scalar_lea.vmem [#allocation10], %s1089_s15 }
  0x80   : > { %1597 = vsyncadd (%p2125_p5), [#allocation9], 4294965248  ;;  %v497_v1 = vld [vmem:[#allocation7 + $0x78] sm:$0xff]  ;;  %1108 = vmatprep.subr.mxu0 %v513_v0  ;;  %v496_v3 = vld [vmem:[#allocation7 + $0x70] sm:$0xff]  ;;  %s900_s26 = scalar_lea.sflag [#allocation4], %s1881_s21 }
  0x81   : > { %v529_v4 = vld [vmem:[#allocation7 + $0x178] sm:$0xff]  ;;  %1109 = vmatpush3.msra.mxu0 %v497_v1  ;;  %v528_v6 = vld [vmem:[#allocation7 + $0x170] sm:$0xff]  ;;  %v495_v7 = vld [vmem:[#allocation7 + $0x68] sm:$0xff] }
  0x82   : > { %1212 = vmatprep.subr.mxu1 %v529_v4  ;;  %1110 = vmatprep.subr.mxu0 %v512_v2  ;;  %v527_v8 = vld [vmem:[#allocation7 + $0x168] sm:$0xff]  ;;  %v510_v9 = vld [vmem:[#allocation7 + $0xe0] sm:$0xff]  ;;  %v509_v12 = vld [vmem:[#allocation7 + $0xd8] sm:$0xff] }
  0x83   : > { %1213 = vmatpush3.msra.mxu1 %v529_v4  ;;  %1111 = vmatpush3.msra.mxu0 %v496_v3  ;;  %v494_v10 = vld [vmem:[#allocation7 + $0x60] sm:$0xff]  ;;  %v493_v13 = vld [vmem:[#allocation7 + $0x58] sm:$0xff]  ;;  %v508_v15 = vld [vmem:[#allocation7 + $0xd0] sm:$0xff] }
  0x84   : > { %1214 = vmatprep.subr.mxu1 %v528_v6  ;;  %1112 = vmatprep.subr.mxu0 %v511_v5  ;;  %v526_v11 = vld [vmem:[#allocation7 + $0x160] sm:$0xff]  ;;  %v525_v14 = vld [vmem:[#allocation7 + $0x158] sm:$0xff]  ;;  %v492_v16 = vld [vmem:[#allocation7 + $0x50] sm:$0xff] }
  0x85   : > { %1215 = vmatpush3.msra.mxu1 %v528_v6  ;;  %1113 = vmatpush3.msra.mxu0 %v495_v7  ;;  %v524_v17 = vld [vmem:[#allocation7 + $0x150] sm:$0xff]  ;;  %v507_v18 = vld [vmem:[#allocation7 + $0xc8] sm:$0xff]  ;;  %v506_v21 = vld [vmem:[#allocation7 + $0xc0] sm:$0xff] }
  0x86   : > { %1216 = vmatprep.subr.mxu1 %v527_v8  ;;  %1114 = vmatprep.subr.mxu0 %v510_v9  ;;  %v491_v19 = vld [vmem:[#allocation7 + $0x48] sm:$0xff]  ;;  %v490_v22 = vld [vmem:[#allocation7 + $0x40] sm:$0xff]  ;;  %v505_v24 = vld [vmem:[#allocation7 + $0xb8] sm:$0xff] }
  0x87   : > { %1217 = vmatpush3.msra.mxu1 %v527_v8  ;;  %1115 = vmatpush3.msra.mxu0 %v494_v10  ;;  %v523_v20 = vld [vmem:[#allocation7 + $0x148] sm:$0xff]  ;;  %v522_v23 = vld [vmem:[#allocation7 + $0x140] sm:$0xff]  ;;  %v489_v25 = vld [vmem:[#allocation7 + $0x38] sm:$0xff] }
  0x88   : > { %1218 = vmatprep.subr.mxu1 %v526_v11  ;;  %1116 = vmatprep.subr.mxu0 %v509_v12  ;;  %v521_v26 = vld [vmem:[#allocation7 + $0x138] sm:$0xff]  ;;  %v504_v27 = vld [vmem:[#allocation7 + $0xb0] sm:$0xff]  ;;  %v503_v30 = vld [vmem:[#allocation7 + $0xa8] sm:$0xff] }
  0x89   : > { %1219 = vmatpush3.msra.mxu1 %v526_v11  ;;  %1117 = vmatpush3.msra.mxu0 %v493_v13  ;;  %v488_v28 = vld [vmem:[#allocation7 + $0x30] sm:$0xff]  ;;  %v487_v31 = vld [vmem:[#allocation7 + $0x28] sm:$0xff]  ;;  %v1910_v33 = vld [vmem:[%s1887_s16] sm:$0xff] }
  0x8a   : > { %1220 = vmatprep.subr.mxu1 %v525_v14  ;;  %1118 = vmatprep.subr.mxu0 %v508_v15  ;;  %v520_v29 = vld [vmem:[#allocation7 + $0x130] sm:$0xff]  ;;  %v519_v32 = vld [vmem:[#allocation7 + $0x128] sm:$0xff]  ;;  %v502_v35 = vld [vmem:[#allocation7 + $0xa0] sm:$0xff]  ;;  %v425_v39 = vrot.slane %v1910_v33, 2  ;;  %v454_v53 = vrot.slane %v1910_v33, 4 }
  0x8b   : > { %1221 = vmatpush3.msra.mxu1 %v525_v14  ;;  %1119 = vmatpush3.msra.mxu0 %v492_v16  ;;  %v1913_v34 = vld [vmem:[%s1887_s16 + $0x8] sm:$0xff]  ;;  %v486_v36 = vld [vmem:[#allocation7 + $0x20] sm:$0xff]  ;;  %v501_v38 = vld [vmem:[#allocation7 + $0x98] sm:$0xff] }
  0x8c   : > { %1222 = vmatprep.subr.mxu1 %v524_v17  ;;  %1120 = vmatprep.subr.mxu0 %v507_v18  ;;  %v518_v37 = vld [vmem:[#allocation7 + $0x120] sm:$0xff]  ;;  %v426_v40 = vrot.slane %v1913_v34, 2  ;;  %v485_v41 = vld [vmem:[#allocation7 + $0x18] sm:$0xff]  ;;  %v500_v43 = vld [vmem:[#allocation7 + $0x90] sm:$0xff]  ;;  %v455_v54 = vrot.slane %v1913_v34, 4 }
  0x8d   : > { %1223 = vmatpush3.msra.mxu1 %v524_v17  ;;  %1121 = vmatpush3.msra.mxu0 %v491_v19  ;;  %v517_v42 = vld [vmem:[#allocation7 + $0x118] sm:$0xff]  ;;  %v408_v44 = vld [vmem:[%s1895_s2] sm:$0xff]  ;;  %v484_v45 = vld [vmem:[#allocation7 + $0x10] sm:$0xff] }
  0x8e   : > { %1224 = vmatprep.subr.mxu1 %v523_v20  ;;  %1122 = vmatprep.subr.mxu0 %v506_v21  ;;  %v516_v46 = vld [vmem:[#allocation7 + $0x110] sm:$0xff]  ;;  %v499_v47 = vld [vmem:[#allocation7 + $0x88] sm:$0xff]  ;;  %v1919_v48 = vsel %vm424_vm0, %v425_v39, %v426_v40  ;;  %v498_v50 = vld [vmem:[#allocation7 + $0x80] sm:$0xff]  ;;  %v428_v51 = vrot.slane %v408_v44, 2  ;;  %v457_v58 = vrot.slane %v408_v44, 4  ;;  %v456_v2 = vsel %vm453_vm1, %v454_v53, %v455_v54 }
  0x8f   : > { %1225 = vmatpush3.msra.mxu1 %v523_v20  ;;  %1123 = vmatpush3.msra.mxu0 %v490_v22  ;;  %v483_v49 = vld [vmem:[#allocation7 + $0x8] sm:$0xff]  ;;  %v402_v55 = vld [vmem:[%s1887_s16 + $0x10] sm:$0xff]  ;;  %v1925_v56 = vld [vmem:[%s1887_s16 + $0x18] sm:$0xff] }
  0x90   : > { %1226 = vmatprep.subr.mxu1 %v522_v23  ;;  %1124 = vmatprep.subr.mxu0 %v505_v24  ;;  %v515_v52 = vld [vmem:[#allocation7 + $0x108] sm:$0xff]  ;;  %v482_v57 = vld [vmem:[#allocation7] sm:$0xff]  ;;  %v459_v61 = vrot.slane %v402_v55, 4  ;;  %v460_v62 = vrot.slane %v1925_v56, 4  ;;  %v1931_v63 = vsel %vm424_vm0, %v426_v40, %v428_v51  ;;  %v430_v0 = vrot.slane %v402_v55, 2  ;;  %v770_v3 = vld [vmem:[#allocation8 + $0x78] sm:$0xff] }
  0x91   : > { %1227 = vmatpush3.msra.mxu1 %v522_v23  ;;  %1125 = vmatpush3.msra.mxu0 %v489_v25  ;;  %v514_v59 = vld [vmem:[#allocation7 + $0x100] sm:$0xff]  ;;  %v409_v60 = vld [vmem:[%s1895_s2 + $0x8] sm:$0xff]  ;;  %v431_v1 = vrot.slane %v1925_v56, 2  ;;  %v458_v4 = vsel %vm453_vm1, %v455_v54, %v457_v58  ;;  %v410_v9 = vld [vmem:[%s1895_s2 + $0x10] sm:$0xff] }
  0x92   : > { %1228 = vmatprep.subr.mxu1 %v521_v26  ;;  %1126 = vmatprep.subr.mxu0 %v504_v27  ;;  %v462_v5 = vrot.slane %v409_v60, 4  ;;  %v1938_v6 = vld [vmem:[%s1887_s16 + $0x20] sm:$0xff]  ;;  %v1941_v7 = vld [vmem:[%s1887_s16 + $0x28] sm:$0xff]  ;;  %v461_v8 = vsel %vm453_vm1, %v459_v61, %v460_v62  ;;  %v433_v13 = vrot.slane %v409_v60, 2  ;;  %v769_v14 = vld [vmem:[#allocation8 + $0x70] sm:$0xff]  ;;  %v467_v16 = vrot.slane %v410_v9, 4 }
  0x93   : > { %1229 = vmatpush3.msra.mxu1 %v521_v26  ;;  %1127 = vmatpush3.msra.mxu0 %v488_v28  ;;  %v464_v10 = vrot.slane %v1938_v6, 4  ;;  %v465_v11 = vrot.slane %v1941_v7, 4  ;;  %v1949_v12 = vsel %vm424_vm0, %v430_v0, %v431_v1  ;;  %v1954_v17 = vld [vmem:[%s1887_s16 + $0x30] sm:$0xff]  ;;  %v1957_v18 = vld [vmem:[%s1887_s16 + $0x38] sm:$0xff]  ;;  %v768_v19 = vld [vmem:[#allocation8 + $0x68] sm:$0xff]  ;;  %v435_v25 = vrot.slane %v1938_v6, 2 }
  0x94   : > { %1230 = vmatprep.subr.mxu1 %v520_v29  ;;  %1128 = vmatprep.subr.mxu0 %v503_v30  ;;  %v463_v15 = vsel %vm453_vm1, %v460_v62, %v462_v5  ;;  %v411_v21 = vld [vmem:[%s1895_s2 + $0x18] sm:$0xff]  ;;  %v469_v22 = vrot.slane %v1954_v17, 4  ;;  %v470_v23 = vrot.slane %v1957_v18, 4  ;;  %v1965_v24 = vsel %vm424_vm0, %v431_v1, %v433_v13  ;;  %v767_v27 = vld [vmem:[#allocation8 + $0x60] sm:$0xff]  ;;  %v764_v39 = vld [vmem:[#allocation8 + $0x48] sm:$0xff] }
  0x95   : > { %1231 = vmatpush3.msra.mxu1 %v520_v29  ;;  %1129 = vmatpush3.msra.mxu0 %v487_v31  ;;  %v466_v20 = vsel %vm453_vm1, %v464_v10, %v465_v11  ;;  %v436_v26 = vrot.slane %v1941_v7, 2  ;;  %v468_v28 = vsel %vm453_vm1, %v465_v11, %v467_v16  ;;  %v472_v29 = vrot.slane %v411_v21, 4  ;;  %v763_v40 = vld [vmem:[#allocation8 + $0x40] sm:$0xff]  ;;  %v756_v51 = vld [vmem:[#allocation8 + $0x8] sm:$0xff] }
  0x96   : > { %1232 = vmatprep.subr.mxu1 %v519_v32  ;;  %1130 = vmatprep.subr.mxu0 %v502_v35  ;;  %v471_v30 = vsel %vm453_vm1, %v469_v22, %v470_v23  ;;  %v765_v35 = vld [vmem:[#allocation8 + $0x50] sm:$0xff] }
  0x97   : > { %1233 = vmatpush3.msra.mxu1 %v519_v32  ;;  %1131 = vmatpush3.msra.mxu0 %v486_v36  ;;  %v1973_v31 = vsel %vm424_vm0, %v435_v25, %v436_v26  ;;  %v438_v32 = vrot.slane %v410_v9, 2 }
  0x98   : > { %1234 = vmatprep.subr.mxu1 %v518_v37  ;;  %1132 = vmatprep.subr.mxu0 %v501_v38  ;;  %v441_v38 = vrot.slane %v1957_v18, 2 }
  0x99   : > { %1235 = vmatpush3.msra.mxu1 %v518_v37  ;;  %1133 = vmatpush3.msra.mxu0 %v485_v41  ;;  %v1979_v36 = vsel %vm424_vm0, %v436_v26, %v438_v32  ;;  %v440_v37 = vrot.slane %v1954_v17, 2 }
  0x9a   : > { %1236 = vmatprep.subr.mxu1 %v517_v42  ;;  %1134 = vmatprep.subr.mxu0 %v500_v43  ;;  %v762_v43 = vld [vmem:[#allocation8 + $0x38] sm:$0xff] }
  0x9b   : > { %1237 = vmatpush3.msra.mxu1 %v517_v42  ;;  %1135 = vmatpush3.msra.mxu0 %v484_v45  ;;  %v1986_v41 = vsel %vm424_vm0, %v440_v37, %v441_v38  ;;  %v443_v42 = vrot.slane %v411_v21, 2  ;;  %v761_v45 = vld [vmem:[#allocation8 + $0x30] sm:$0xff] }
  0x9c   : > { %1238 = vmatprep.subr.mxu1 %v516_v46  ;;  %1136 = vmatprep.subr.mxu0 %v499_v47  ;;  %v759_v47 = vld [vmem:[#allocation8 + $0x20] sm:$0xff] }
  0x9d   : > { %601 = vmatprep.mubr.f32.mxu0 %v1919_v48  ;;  %1137 = vmatpush3.msra.mxu0 %v483_v49  ;;  %v1991_v44 = vsel %vm424_vm0, %v441_v38, %v443_v42  ;;  %v758_v49 = vld [vmem:[#allocation8 + $0x18] sm:$0xff] }
  0x9e   : > { %1239 = vmatpush3.msra.mxu1 %v516_v46  ;;  %1138 = vmatprep.subr.mxu0 %v498_v50  ;;  %v760_v46 = vld [vmem:[#allocation8 + $0x28] sm:$0xff]  ;;  %v757_v50 = vld [vmem:[#allocation8 + $0x10] sm:$0xff] }
  0x9f   : > { %1240 = vmatprep.subr.mxu1 %v515_v52  ;;  %1139 = vmatpush3.msra.mxu0 %v482_v57 }
  0xa0   : > { %1241 = vmatpush3.msra.mxu1 %v515_v52  ;;  %602 = vmatmul.mubr.f32.vlgmr.msra.gmra.mxu0 %v1910_v33  ;;  %v766_v33 = vld [vmem:[#allocation8 + $0x58] sm:$0xff]  ;;  %v755_v52 = vld [vmem:[#allocation8] sm:$0xff] }
  0xa1   : > { %1242 = vmatprep.subr.mxu1 %v514_v59  ;;  %606 = vmatprep.mubr.f32.mxu0 %v1931_v63 }
  0xa2   : > { %1243 = vmatpush3.msra.mxu1 %v514_v59  ;;  %1244 = vmatprep.mubr.f32.mxu1 %v456_v2 }
  0xa3   : > { %1256 = vmatprep.subr.mxu0 %v770_v3  ;;  %1245 = vmatmul.mubr.f32.vlgmr.msra.gmra.mxu1 %v458_v4 }
  0xa4   : > { %1257 = vmatpush3.msra.mxu0 %v770_v3  ;;  %1247 = vmatprep.mubr.f32.mxu1 %v461_v8 }
  0xa5   : > { %607 = vmatmul.mubr.f32.gmra.mxu0 %v1913_v34  ;;  %1258 = vmatprep.subr.mxu0 %v769_v14  ;;  %v473_v34 = vsel %vm453_vm1, %v470_v23, %v472_v29 }
  0xa6   : > { %611 = vmatprep.mubr.f32.mxu0 %v1949_v12  ;;  %1259 = vmatpush3.msra.mxu0 %v769_v14 }
  0xa7   : > { %1300 = vmatprep.subr.mxu1 %v770_v3  ;;  %1248 = vmatmul.mubr.f32.gmra.mxu1 %v463_v15 }
  0xa8   : > { %1260 = vmatprep.subr.mxu0 %v768_v19  ;;  %1250 = vmatprep.mubr.f32.mxu1 %v466_v20 }
  0xa9   : > { %612 = vmatmul.mubr.f32.gmra.mxu0 %v402_v55  ;;  %1316 = vmatpush3.msra.mxu1 %v770_v3  ;;  %v1094_v55 = vld [vmem:[%s2077_s3] ss:$0 sm:$0xff] }
  0xaa   : > { %616 = vmatprep.mubr.f32.mxu0 %v1965_v24  ;;  %1261 = vmatpush3.msra.mxu0 %v768_v19 }
  0xab   : > { %1262 = vmatprep.subr.mxu0 %v767_v27  ;;  %1251 = vmatmul.mubr.f32.gmra.mxu1 %v468_v28 }
  0xac   : > { %1263 = vmatpush3.msra.mxu0 %v767_v27  ;;  %1253 = vmatprep.mubr.f32.mxu1 %v471_v30 }
  0xad   : > { %617 = vmatmul.mubr.f32.gmra.mxu0 %v1925_v56  ;;  %1264 = vmatprep.subr.mxu0 %v766_v33 }
  0xae   : > { %621 = vmatprep.mubr.f32.mxu0 %v1973_v31  ;;  %1265 = vmatpush3.msra.mxu0 %v766_v33 }
  0xaf   : > { %1301 = vmatprep.subr.mxu1 %v769_v14  ;;  %1254 = vmatmul.mubr.f32.gmra.mxu1 %v473_v34 }
  0xb0   : > { %1266 = vmatprep.subr.mxu0 %v765_v35  ;;  %1317 = vmatpush3.msra.mxu1 %v769_v14 }
  0xb1   : > { %622 = vmatmul.mubr.f32.gmra.mxu0 %v1938_v6  ;;  %1302 = vmatprep.subr.mxu1 %v768_v19 }
  0xb2   : > { %626 = vmatprep.mubr.f32.mxu0 %v1979_v36  ;;  %1267 = vmatpush3.msra.mxu0 %v765_v35 }
  0xb3   : > { %1268 = vmatprep.subr.mxu0 %v764_v39  ;;  %1318 = vmatpush3.msra.mxu1 %v768_v19 }
  0xb4   : > { %1269 = vmatpush3.msra.mxu0 %v764_v39  ;;  %1303 = vmatprep.subr.mxu1 %v767_v27 }
  0xb5   : > { %627 = vmatmul.mubr.f32.gmra.mxu0 %v1941_v7  ;;  %1270 = vmatprep.subr.mxu0 %v763_v40 }
  0xb6   : > { %631 = vmatprep.mubr.f32.mxu0 %v1986_v41  ;;  %1271 = vmatpush3.msra.mxu0 %v763_v40 }
  0xb7   : > { %1272 = vmatprep.subr.mxu0 %v762_v43  ;;  %1319 = vmatpush3.msra.mxu1 %v767_v27 }
  0xb8   : > { %1273 = vmatpush3.msra.mxu0 %v762_v43  ;;  %1304 = vmatprep.subr.mxu1 %v766_v33 }
  0xb9   : > { %632 = vmatmul.mubr.f32.gmra.mxu0 %v1954_v17  ;;  %1320 = vmatpush3.msra.mxu1 %v766_v33 }
  0xba   : > { %636 = vmatprep.mubr.f32.mxu0 %v1991_v44  ;;  %1305 = vmatprep.subr.mxu1 %v765_v35 }
  0xbb   : > { %1321 = vmatpush3.msra.mxu1 %v765_v35  ;;  %1274 = vmatprep.subr.mxu0 %v761_v45 }
  0xbc   : > { %1306 = vmatprep.subr.mxu1 %v764_v39  ;;  %1275 = vmatpush3.msra.mxu0 %v761_v45 }
  0xbd   : > { %637 = vmatmul.mubr.f32.gmra.mxu0 %v1957_v18  ;;  %1322 = vmatpush3.msra.mxu1 %v764_v39 }
  0xbe   : > { %1307 = vmatprep.subr.mxu1 %v763_v40  ;;  %1276 = vmatprep.subr.mxu0 %v760_v46 }
  0xbf   : > { %1323 = vmatpush3.msra.mxu1 %v763_v40  ;;  %1277 = vmatpush3.msra.mxu0 %v760_v46 }
  0xc0   : > { %1308 = vmatprep.subr.mxu1 %v762_v43  ;;  %1278 = vmatprep.subr.mxu0 %v759_v47 }
  0xc1   : > { %1324 = vmatpush3.msra.mxu1 %v762_v43  ;;  %1279 = vmatpush3.msra.mxu0 %v759_v47 }
  0xc2   : > { %1309 = vmatprep.subr.mxu1 %v761_v45  ;;  %1280 = vmatprep.subr.mxu0 %v758_v49 }
  0xc3   : > { %1325 = vmatpush3.msra.mxu1 %v761_v45  ;;  %1281 = vmatpush3.msra.mxu0 %v758_v49 }
  0xc4   : > { %1310 = vmatprep.subr.mxu1 %v760_v46  ;;  %1282 = vmatprep.subr.mxu0 %v757_v50 }
  0xc5   : > { %1326 = vmatpush3.msra.mxu1 %v760_v46  ;;  %1283 = vmatpush3.msra.mxu0 %v757_v50 }
  0xc6   : > { %1311 = vmatprep.subr.mxu1 %v759_v47  ;;  %1284 = vmatprep.subr.mxu0 %v756_v51 }
  0xc7   : > { %1327 = vmatpush3.msra.mxu1 %v759_v47  ;;  %1285 = vmatpush3.msra.mxu0 %v756_v51 }
  0xc8   : > { %1312 = vmatprep.subr.mxu1 %v758_v49  ;;  %1286 = vmatprep.subr.mxu0 %v755_v52 }
  0xc9   : > { %1328 = vmatpush3.msra.mxu1 %v758_v49  ;;  %1287 = vmatpush3.msra.mxu0 %v755_v52 }
  0xca   : > { %1313 = vmatprep.subr.mxu1 %v757_v50 }
  0xcb   : > { %1329 = vmatpush3.msra.mxu1 %v757_v50 }
  0xcc   : > { %1314 = vmatprep.subr.mxu1 %v756_v51 }
  0xcd   : > { %1330 = vmatpush3.msra.mxu1 %v756_v51 }
  0xce   : > { %1315 = vmatprep.subr.mxu1 %v755_v52 }
  0xcf   : > { %1331 = vmatpush3.msra.mxu1 %v755_v52 }
 0x160   : > { %v1140_v53 = vpop.f32.mrf.mxu0 }
 0x162   : > { %v1141_v54 = vpop.f32.mrf.mxu0 }
 0x163   : > { %v1142_v56 = vadd.f32 %v1141_v54, %v1140_v53  ;;  %v1246_v57 = vpop.f32.mrf.mxu1  ;;  %v1095_v54 = vld [vmem:[%s2079_s5] ss:$0 sm:$0xff] }
 0x165   : > { %v1143_v58 = vpop.f32.mrf.mxu0  ;;  %v604_v59 = vadd.f32 %v1142_v56, %v1094_v55  ;;  %v708_v60 = vpop.f32.mrf.mxu1 }
 0x167   : > { %v1144_v61 = vpop.f32.mrf.mxu0  ;;  %v709_v0 = vadd.f32 %v708_v60, %v604_v59  ;;  %v1249_v2 = vpop.f32.mrf.mxu1 }
 0x168   : > { %v1145_v62 = vadd.f32 %v1144_v61, %v1143_v58 }
 0x169   : > { %v1146_v1 = vpop.f32.mrf.mxu0  ;;  %v747_v4 = vmax.f32 %v709_v0, 0.0  ;;  %v718_v9 = vpop.f32.mrf.mxu1 }
 0x16a   : > { %v609_v3 = vadd.f32 %v1145_v62, %v1094_v55 }
 0x16b   : > { %v1147_v5 = vpop.f32.mrf.mxu0  ;;  %1288 = vmatprep.mubr.f32.mxu0 %v747_v4  ;;  %v1252_v17 = vpop.f32.mrf.mxu1 }
 0x16c   : > { %v714_v6 = vadd.f32 %v1246_v57, %v609_v3  ;;  %v1148_v7 = vadd.f32 %v1147_v5, %v1146_v1 }
 0x16d   : > { %v1149_v8 = vpop.f32.mrf.mxu0  ;;  %v728_v25 = vpop.f32.mrf.mxu1 }
 0x16e   : > { %v748_v10 = vmax.f32 %v714_v6, 0.0  ;;  %v614_v11 = vadd.f32 %v1148_v7, %v1094_v55 }
 0x16f   : > { %v1150_v13 = vpop.f32.mrf.mxu0  ;;  %v1255_v33 = vpop.f32.mrf.mxu1 }
 0x170   : > { %v1151_v14 = vadd.f32 %v1150_v13, %v1149_v8  ;;  %v719_v15 = vadd.f32 %v718_v9, %v614_v11  ;;  %1289 = vmatmul.mubr.f32.vlgmr.msra.gmra.mxu0 %v748_v10 }
 0x171   : > { %v1152_v16 = vpop.f32.mrf.mxu0  ;;  %v738_v42 = vpop.f32.mrf.mxu1 }
 0x172   : > { %v619_v18 = vadd.f32 %v1151_v14, %v1094_v55  ;;  %v749_v19 = vmax.f32 %v719_v15, 0.0 }
 0x173   : > { %v1153_v20 = vpop.f32.mrf.mxu0 }
 0x174   : > { %v1154_v21 = vadd.f32 %v1153_v20, %v1152_v16  ;;  %1291 = vmatprep.mubr.f32.mxu0 %v749_v19  ;;  %v724_v22 = vadd.f32 %v1249_v2, %v619_v18 }
 0x175   : > { %v1155_v23 = vpop.f32.mrf.mxu0 }
 0x176   : > { %v624_v26 = vadd.f32 %v1154_v21, %v1094_v55  ;;  %v750_v27 = vmax.f32 %v724_v22, 0.0 }
 0x177   : > { %v1156_v28 = vpop.f32.mrf.mxu0 }
 0x178   : > { %v1157_v29 = vadd.f32 %v1156_v28, %v1155_v23  ;;  %v729_v30 = vadd.f32 %v728_v25, %v624_v26  ;;  %1292 = vmatmul.mubr.f32.gmra.mxu0 %v750_v27 }
 0x179   : > { %v1158_v32 = vpop.f32.mrf.mxu0 }
 0x17a   : > { %v629_v34 = vadd.f32 %v1157_v29, %v1094_v55  ;;  %v751_v35 = vmax.f32 %v729_v30, 0.0 }
 0x17b   : > { %v1159_v37 = vpop.f32.mrf.mxu0 }
 0x17c   : > { %v734_v38 = vadd.f32 %v1252_v17, %v629_v34  ;;  %v1160_v39 = vadd.f32 %v1159_v37, %v1158_v32  ;;  %1294 = vmatprep.mubr.f32.mxu1 %v751_v35 }
 0x17d   : > { %v1161_v40 = vpop.f32.mrf.mxu0 }
 0x17e   : > { %v752_v43 = vmax.f32 %v734_v38, 0.0  ;;  %v634_v45 = vadd.f32 %v1160_v39, %v1094_v55 }
 0x17f   : > { %v1162_v46 = vpop.f32.mrf.mxu0 }
 0x180   : > { %v1163_v47 = vadd.f32 %v1162_v46, %v1161_v40  ;;  %v739_v49 = vadd.f32 %v738_v42, %v634_v45  ;;  %1295 = vmatmul.mubr.f32.vlgmr.msra.gmra.mxu1 %v752_v43 }
 0x182   : > { %v639_v50 = vadd.f32 %v1163_v47, %v1094_v55  ;;  %v753_v51 = vmax.f32 %v739_v49, 0.0 }
 0x184   : > { %1297 = vmatprep.mubr.f32.mxu1 %v753_v51  ;;  %v744_v52 = vadd.f32 %v1255_v33, %v639_v50 }
 0x186   : > { %v754_v53 = vmax.f32 %v744_v52, 0.0 }
 0x188   : > { %1298 = vmatmul.mubr.f32.gmra.mxu1 %v754_v53 }
 0x230   : > { %v1290_v56 = vpop.f32.mrf.mxu0 }
 0x231   : > { %v850_v57 = vadd.f32 %v1290_v56, %v1095_v54 }
 0x232   : > { %v844_v58 = vpop.f32.mrf.mxu0 }
 0x233   : > { %v884_v59 = vadd.f32 %v850_v57, %v1931_v63  ;;  %v845_v60 = vadd.f32 %v1095_v54, %v844_v58 }
 0x235   : > { %892 = vst [vmem:[%s2005_s28 + $0x8] sm:$0xff] %v884_v59  ;;  %v883_v55 = vadd.f32 %v845_v60, %v1919_v48 }
 0x237   : > { %891 = vst [vmem:[%s2005_s28] sm:$0xff] %v883_v55 }
 0x238   : > { %v1293_v61 = vpop.f32.mrf.mxu0 }
 0x239   : > { %v860_v62 = vadd.f32 %v1293_v61, %v1095_v54 }
 0x23a   : > { %v854_v0 = vpop.f32.mrf.mxu0 }
 0x23b   : > { %v886_v1 = vadd.f32 %v860_v62, %v1965_v24  ;;  %v855_v63 = vadd.f32 %v1095_v54, %v854_v0 }
 0x23d   : > { %894 = vst [vmem:[%s2005_s28 + $0x18] sm:$0xff] %v886_v1  ;;  %v885_v2 = vadd.f32 %v855_v63, %v1949_v12 }
 0x23f   : > { %893 = vst [vmem:[%s2005_s28 + $0x10] sm:$0xff] %v885_v2 }
 0x240   : > { %v1296_v3 = vpop.f32.mrf.mxu1 }
 0x241   : > { %v870_v4 = vadd.f32 %v1296_v3, %v1095_v54 }
 0x242   : > { %v864_v5 = vpop.f32.mrf.mxu1 }
 0x243   : > { %v888_v48 = vadd.f32 %v870_v4, %v1979_v36  ;;  %v865_v6 = vadd.f32 %v1095_v54, %v864_v5 }
 0x245   : > { %896 = vst [vmem:[%s2005_s28 + $0x28] sm:$0xff] %v888_v48  ;;  %v887_v7 = vadd.f32 %v865_v6, %v1973_v31 }
 0x247   : > { %895 = vst [vmem:[%s2005_s28 + $0x20] sm:$0xff] %v887_v7 }
 0x248   : > { %v1299_v8 = vpop.f32.mrf.mxu1 }
 0x249   : > { %v880_v24 = vadd.f32 %v1299_v8, %v1095_v54 }
 0x24a   : > { %v874_v9 = vpop.f32.mrf.mxu1 }
 0x24b   : > { %v890_v10 = vadd.f32 %v880_v24, %v1991_v44  ;;  %v875_v11 = vadd.f32 %v1095_v54, %v874_v9 }
 0x24d   : > { %898 = vst [vmem:[%s2005_s28 + $0x38] sm:$0xff] %v890_v10  ;;  %v889_v12 = vadd.f32 %v875_v11, %v1986_v41 }
 0x24f   : > { %897 = vst [vmem:[%s2005_s28 + $0x30] sm:$0xff] %v889_v12 }
 0x250   : > { %s2126_s8 = sld [smem:[#allocation23_spill]]  ;;  %s926_s10 = sshll.u32 %s2005_s28, 4  ;;  %s927_s10 = int_to_ptr.vmem [resolvable:$true] %s926_s10 }
 0x251   : > { %s2127_s17 = sld [smem:[#allocation28_spill]]  ;;  %s1652_s9 = smov 256  }
 0x252   : > { %s2128_s0 = sld [smem:[#allocation33_spill]]  ;;  %s1653_s21 = smov 512  }
 0x253   : > { %s1654_s15 = smov 2   ;;  %s1655_s18 = smov 128  }
 0x254   : > { %s1656_s16 = smov 8   ;;  %s1657_s27 = smov 131072  }
 0x255   : > { %s1658_s20 = smov 0  }
 0x256   : > { %s1107_s7 = sshll.u32 %s2126_s8, 8 }
 0x257   : > { %p2129_p13 = scmp.ne.s32.totalorder %s2127_s17, 0 }
 0x258   : > { %s915_s6 = scalar_lea.hbm %s2128_s0, %s1107_s7 }
 0x259   : > { %1351 = sst [smem:[#allocation14]] (%p2129_p13), %s1652_s9 }
 0x25a   : > { %1352 = sst [smem:[#allocation14 + $0x1]] (%p2129_p13), %s1653_s21 }
 0x25b   : > { %1353 = sst [smem:[#allocation14 + $0x2]] (%p2129_p13), %s1654_s15 }
 0x25c   : > { %1354 = sst [smem:[#allocation14 + $0x3]] (%p2129_p13), %s1655_s18 }
 0x25d   : > { %1355 = sst [smem:[#allocation14 + $0x4]] (%p2129_p13), %s1655_s18 }
 0x25e   : > { %1356 = sst [smem:[#allocation14 + $0x5]] (%p2129_p13), %s1656_s16 }
 0x25f   : > { %1357 = dma.general (%p2129_p13), %s927_s10, 1024, %s915_s6, %s900_s26, %s1657_s27, [#allocation14], %s1658_s20, 0  }
 0x260 PF: > { %s2130_s14 = sld [smem:[#allocation21_spill]] }
 0x261   : > { %s2131_s19 = sld [smem:[#allocation29_spill]] }
 0x266   : > { %s954_s2 = sand.u32 1, %s2130_s14  }
 0x267   : > { %p2132_p4 = scmp.ne.s32.totalorder %s2131_s19, 0  ;;  %s955_s30 = scalar_lea.sflag [#allocation4], %s954_s2 }
 0x269   : > { %p1367_p9 = pnand %p1079_p6, %p2132_p4 }
 0x26b   : > { %p1368_p10 = pneg %p1367_p9 }
 0x26d   : > { %1599 = dma.done.wait (%p1368_p10), %s955_s30, 1024  }
 0x26e   : > { %1601 = vsyncadd (%p1368_p10), %s955_s30, 4294966272  ;;  %s26_s29 = sadd.s32 1, %s1636_s29   ;;  %s2133_s13 = sld [smem:[#allocation27_spill]] }
 0x26f   : > { %p23_p3 = scmp.ge.s32.totalorder %s26_s29, 4   ;;  %s2134_s12 = sld [smem:[#allocation22_spill]] }
 0x270   : > { %s2135_s26 = sld [smem:[#allocation26_spill]]  ;;  %s2138_s21 = smov %s1608_s22 }
 0x271   : > { %s2136_s27 = sld [smem:[#allocation24_spill]]  ;;  %s2139_s22 = smov %s1612_s23 }
 0x272   : > { %s2137_s28 = sld [smem:[#allocation25_spill]]  ;;  %s2141_s24 = smov %s1620_s25 }
 0x273   :  { %25 = sbr.rel (!%p23_p3) target bundleno = 16 (0x10), region = 120 }
 0x274   : > { %s2140_s23 = smov %s2133_s13 }
 0x275   : > { %s2142_s25 = smov %s2134_s12 }
 0x278   :  { %960 = vsyncpa [#allocation3], 1 }
 0x279   :  { %962 = vsyncpa [#allocation3 + $0x1], 1 }
 0x27a   :  { %963 = vsyncpa [#allocation6], 1 }
 0x27b   :  { %965 = vsyncpa [#allocation6 + $0x1], 1 }
 0x27c   :  { %966 = vsyncpa [#allocation9], 1 }
 0x27d   :  { %967 = vsyncpa [#allocation4], 1 }
 0x27e   :  { %969 = vsyncpa [#allocation4 + $0x1], 1 }

</bundles_post_ra>
